<compile_context>
chip_gen: v7x
topology: tpu7x:2x2x1
jax: 0.10.0
libtpu: 0.0.40
codegen_flags: <defaults>
</compile_context>

<pallas_src>
import functools

import jax
import jax.numpy as jnp
from jax.experimental import pallas as pl
from jax.experimental.pallas import tpu as pltpu


def _round_up(x, m):
    return (x + m - 1) // m * m


# ----------------------------- Pallas kernel ------------------------------ #

def _fused_matmul_kernel(*refs, apply_relu, has_residual):
    """out = act((A @ B_scaled) + bias [+ residual]); bf16 inputs, f32 accum."""
    if has_residual:
        a_ref, b_ref, bias_ref, res_ref, o_ref = refs
    else:
        a_ref, b_ref, bias_ref, o_ref = refs
        res_ref = None
    acc = jnp.dot(a_ref[...], b_ref[...], preferred_element_type=jnp.float32)
    out = acc + bias_ref[...]
    if res_ref is not None:
        out = out + res_ref[...]
    if apply_relu:
        out = jnp.maximum(out, 0.0)
    o_ref[...] = out.astype(o_ref.dtype)


def _vmem_bytes(tm, kp, np_, has_residual, out_bytes):
    a = 2 * tm * kp * 2                  # A tiles, bf16, double-buffered
    b = kp * np_ * 2                     # resident scaled weights, bf16
    bias = np_ * 4
    out = 2 * tm * np_ * out_bytes       # output tiles, double-buffered
    res = 2 * tm * np_ * 4 if has_residual else 0
    return a + b + bias + out + res


def fused_matmul_bn(a, b_scaled, bias, residual=None, *, apply_relu,
                    out_dtype=jnp.float32, tm_target=512):
    """Fused (A @ B_scaled) + bias [+ residual] [+ relu] on the MXU.

    a:        (M, K)  activations / im2col patches (any float dtype)
    b_scaled: (K, N)  weights with the folded BN scale already applied
    bias:     (N,) or (1, N) folded BN bias
    residual: optional (M, N) added before the final activation
    """
    M, K = a.shape
    Kb, N = b_scaled.shape
    assert K == Kb, (K, Kb)
    bias = bias.reshape(1, -1).astype(jnp.float32)
    has_residual = residual is not None
    out_bytes = jnp.dtype(out_dtype).itemsize

    # TPU-friendly padding: lane-dense N, MXU-friendly K, bf16-friendly M tile.
    Kp = _round_up(K, 128)
    Np = _round_up(N, 128)
    tm = min(tm_target, _round_up(M, 16))

    # Keep the working set well inside v7x's 64 MiB/TC VMEM.
    vmem_budget = 40 * 1024 * 1024
    while tm > 16 and _vmem_bytes(tm, Kp, Np, has_residual, out_bytes) > vmem_budget:
        tm = _round_up(tm // 2, 16)

    # Give v7x's two TensorCores something to split when M is small.
    if pl.cdiv(M, tm) < 2 and tm >= 32 and tm % 32 == 0:
        tm //= 2

    Mp = pl.cdiv(M, tm) * tm

    a_p = jnp.pad(a.astype(jnp.bfloat16), ((0, Mp - M), (0, Kp - K)))
    b_p = jnp.pad(b_scaled.astype(jnp.bfloat16), ((0, Kp - K), (0, Np - N)))
    bias_p = jnp.pad(bias, ((0, 0), (0, Np - N)))

    inputs = [a_p, b_p, bias_p]
    in_specs = [
        pl.BlockSpec((tm, Kp), lambda i: (i, 0)),   # A tile (bf16)
        pl.BlockSpec((Kp, Np), lambda i: (0, 0)),   # resident scaled weights
        pl.BlockSpec((1, Np), lambda i: (0, 0)),    # folded BN bias
    ]
    if has_residual:
        res_p = jnp.pad(residual.astype(jnp.float32),
                        ((0, Mp - M), (0, Np - N)))
        inputs.append(res_p)
        in_specs.append(pl.BlockSpec((tm, Np), lambda i: (i, 0)))

    kernel = functools.partial(_fused_matmul_kernel, apply_relu=apply_relu,
                               has_residual=has_residual)

    bytes_accessed = (Mp * Kp * 2 + Kp * Np * 2 + Np * 4
                      + (Mp * Np * 4 if has_residual else 0)
                      + Mp * Np * out_bytes)

    out_p = pl.pallas_call(
        kernel,
        out_shape=jax.ShapeDtypeStruct((Mp, Np), out_dtype),
        grid_spec=pltpu.PrefetchScalarGridSpec(
            num_scalar_prefetch=0,
            grid=(Mp // tm,),
            in_specs=in_specs,
            out_specs=pl.BlockSpec((tm, Np), lambda i: (i, 0)),
        ),
        compiler_params=pltpu.CompilerParams(
            dimension_semantics=("parallel",),
            vmem_limit_bytes=64 * 1024 * 1024),
        cost_estimate=pl.CostEstimate(
            flops=2 * Mp * Kp * Np,
            transcendentals=0,
            bytes_accessed=bytes_accessed),
    )(*inputs)

    return out_p[:M, :N]


# ------------------------------ JAX glue ---------------------------------- #

def _im2col_3x3(x_nhwc, stride):
    """3x3, pad=1 patch extraction. Returns (N*Ho*Wo, 9*C) and (N, Ho, Wo)."""
    N, H, W, C = x_nhwc.shape
    Ho = (H + 2 - 3) // stride + 1
    Wo = (W + 2 - 3) // stride + 1
    xp = jnp.pad(x_nhwc, ((0, 0), (1, 1), (1, 1), (0, 0)))
    chunks = []
    for kh in range(3):
        for kw in range(3):
            chunks.append(
                xp[:, kh:kh + (Ho - 1) * stride + 1:stride,
                      kw:kw + (Wo - 1) * stride + 1:stride, :])
    patches = jnp.concatenate(chunks, axis=-1)          # (N, Ho, Wo, 9*C)
    return patches.reshape(N * Ho * Wo, 9 * C), (N, Ho, Wo)


def _fold_bn(gamma, beta, mean, var, eps=1e-5):
    scale = gamma / jnp.sqrt(var + eps)
    bias = beta - mean * scale
    return scale.reshape(1, -1), bias.reshape(1, -1)


def residual_block_forward(x_nchw, params, stride):
    """Forward pass of ResidualBlock. Input/output are NCHW (PyTorch layout)."""
    x = jnp.transpose(x_nchw, (0, 2, 3, 1)).astype(jnp.float32)  # -> NHWC
    N, H, W, Cin = x.shape
    Cout = params['w1'].shape[0]

    # --- conv1 (3x3, stride) + bn1 + relu, fused ---
    a1, (_, Ho, Wo) = _im2col_3x3(x, stride)
    w1 = jnp.transpose(params['w1'], (2, 3, 1, 0)).reshape(9 * Cin, Cout)
    s1, bi1 = _fold_bn(params['g1'], params['b1'], params['m1'], params['v1'])
    y1 = fused_matmul_bn(a1, w1 * s1, bi1, residual=None, apply_relu=True,
                         out_dtype=jnp.bfloat16)      # re-consumed as bf16
    y1 = y1.reshape(N, Ho, Wo, Cout)

    # --- shortcut branch ---
    if stride != 1 or Cin != Cout:
        xs = x[:, ::stride, ::stride, :].reshape(N * Ho * Wo, Cin)
        ws = jnp.transpose(params['ws'], (2, 3, 1, 0)).reshape(Cin, Cout)
        ss, bis = _fold_bn(params['gs'], params['bs'], params['ms'],
                           params['vs'])
        sc = fused_matmul_bn(xs, ws * ss, bis, residual=None,
                             apply_relu=False, out_dtype=jnp.float32)
    else:
        sc = x.reshape(N * Ho * Wo, Cout)

    # --- conv2 (3x3, stride=1) + bn2 + shortcut-add + relu, fused ---
    a2, _ = _im2col_3x3(y1, 1)
    w2 = jnp.transpose(params['w2'], (2, 3, 1, 0)).reshape(9 * Cout, Cout)
    s2, bi2 = _fold_bn(params['g2'], params['b2'], params['m2'], params['v2'])
    y2 = fused_matmul_bn(a2, w2 * s2, bi2, residual=sc, apply_relu=True,
                         out_dtype=jnp.float32)
    y2 = y2.reshape(N, Ho, Wo, Cout)

    return jnp.transpose(y2, (0, 3, 1, 2))  # back to NCHW


# --------------------------- reference (JAX) ------------------------------- #

def reference_forward(x, params, stride):
    def conv(xx, w, s, pad):
        return jax.lax.conv_general_dilated(
            xx, w, (s, s), [(pad, pad), (pad, pad)],
            dimension_numbers=('NCHW', 'OIHW', 'NCHW'))

    def bn(xx, g, b, m, v, eps=1e-5):
        g = g.reshape(1, -1, 1, 1)
        b = b.reshape(1, -1, 1, 1)
        m = m.reshape(1, -1, 1, 1)
        v = v.reshape(1, -1, 1, 1)
        return (xx - m) / jnp.sqrt(v + eps) * g + b

    out = jax.nn.relu(bn(conv(x, params['w1'], stride, 1),
                         params['g1'], params['b1'], params['m1'], params['v1']))
    out = bn(conv(out, params['w2'], 1, 1),
             params['g2'], params['b2'], params['m2'], params['v2'])
    in_c, out_c = params['w1'].shape[1], params['w1'].shape[0]
    if stride != 1 or in_c != out_c:
        sc = bn(conv(x, params['ws'], stride, 0),
                params['gs'], params['bs'], params['ms'], params['vs'])
    else:
        sc = x
    return jax.nn.relu(out + sc)


# ------------------------------- main -------------------------------------- #

if __name__ == "__main__":
    key = jax.random.PRNGKey(0)
    ks = jax.random.split(key, 16)

    in_c, out_c, stride = 4, 8, 2
    N, H, W = 2, 16, 16

    def bn_params(k0, k1, k2, k3, c):
        return (1.0 + 0.1 * jax.random.normal(k0, (c,), jnp.float32),   # gamma
                0.1 * jax.random.normal(k1, (c,), jnp.float32),          # beta
                0.1 * jax.random.normal(k2, (c,), jnp.float32),          # running_mean
                0.5 + jnp.abs(jax.random.normal(k3, (c,), jnp.float32))) # running_var

    g1, b1, m1, v1 = bn_params(ks[1], ks[2], ks[3], ks[4], out_c)
    g2, b2, m2, v2 = bn_params(ks[6], ks[7], ks[8], ks[9], out_c)
    gs, bs, ms, vs = bn_params(ks[11], ks[12], ks[13], ks[14], out_c)

    params = {
        'w1': 0.1 * jax.random.normal(ks[0], (out_c, in_c, 3, 3), jnp.float32),
        'g1': g1, 'b1': b1, 'm1': m1, 'v1': v1,
        'w2': 0.1 * jax.random.normal(ks[5], (out_c, out_c, 3, 3), jnp.float32),
        'g2': g2, 'b2': b2, 'm2': m2, 'v2': v2,
        'ws': 0.1 * jax.random.normal(ks[10], (out_c, in_c, 1, 1), jnp.float32),
        'gs': gs, 'bs': bs, 'ms': ms, 'vs': vs,
    }

    x = jax.random.normal(ks[15], (N, in_c, H, W), jnp.float32)

    out = residual_block_forward(x, params, stride)
    out = jax.block_until_ready(out)

    ref = jax.block_until_ready(reference_forward(x, params, stride))
    assert out.shape == ref.shape, (out.shape, ref.shape)
    # bf16 MXU inputs with f32 accumulation: expect ~1e-2-level worst-case
    # absolute error at these magnitudes.
    max_err = float(jnp.max(jnp.abs(out - ref)))
    assert max_err < 5e-2, f"mismatch vs reference: max abs err = {max_err}"

    print("KERNEL_OK")
</pallas_src>

<mosaic_0001>
module attributes {stable_mosaic.version = 11 : i64} {
  func.func @_fused_matmul_kernel(%arg0: i32, %arg1: memref<64x128xbf16, #tpu.memory_space<vmem>>, %arg2: memref<128x128xbf16, #tpu.memory_space<vmem>>, %arg3: memref<1x128xf32, #tpu.memory_space<vmem>>, %arg4: memref<64x128xbf16, #tpu.memory_space<vmem>>) attributes {dimension_semantics = [#tpu.dimension_semantics<parallel>], iteration_bounds = array<i64: 2>, scalar_prefetch = 0 : i64, scratch_operands = 0 : i64, tpu.core_type = #tpu.core_type<tc>, window_params = [{transform_indices = @transform_0, window_bounds = array<i64: 64, 128>}, {pipeline_mode = #tpu.pipeline_mode<synchronous>, transform_indices = @transform_1, window_bounds = array<i64: 128, 128>}, {pipeline_mode = #tpu.pipeline_mode<synchronous>, transform_indices = @transform_2, window_bounds = array<i64: 1, 128>}, {transform_indices = @transform_3, window_bounds = array<i64: 64, 128>}]} {
    %c0 = arith.constant 0 : index
    %c0_0 = arith.constant 0 : index
    %0 = vector.load %arg1[%c0, %c0_0] : memref<64x128xbf16, #tpu.memory_space<vmem>>, vector<64x128xbf16>
    %c0_1 = arith.constant 0 : index
    %c0_2 = arith.constant 0 : index
    %1 = vector.load %arg2[%c0_1, %c0_2] : memref<128x128xbf16, #tpu.memory_space<vmem>>, vector<128x128xbf16>
    %cst = arith.constant dense<0.000000e+00> : vector<64x128xf32>
    %2 = tpu.matmul %0, %1, %cst {dimension_numbers = #tpu.dot_dimension_numbers<[1], [0], [0], [1], [0, 0, 1, 1], [], []>} : vector<64x128xbf16>, vector<128x128xbf16>, vector<64x128xf32> -> vector<64x128xf32>
    %c0_3 = arith.constant 0 : index
    %c0_4 = arith.constant 0 : index
    %3 = vector.load %arg3[%c0_3, %c0_4] : memref<1x128xf32, #tpu.memory_space<vmem>>, vector<1x128xf32>
    %4 = vector.broadcast %3 : vector<1x128xf32> to vector<64x128xf32>
    %5 = arith.addf %2, %4 : vector<64x128xf32>
    %cst_5 = arith.constant 0.000000e+00 : f32
    %6 = vector.broadcast %cst_5 : f32 to vector<64x128xf32>
    %7 = arith.maximumf %5, %6 : vector<64x128xf32>
    %8 = arith.truncf %7 : vector<64x128xf32> to vector<64x128xbf16>
    %c0_6 = arith.constant 0 : index
    %c0_7 = arith.constant 0 : index
    %9 = vector.load %arg4[%c0_6, %c0_7] : memref<64x128xbf16, #tpu.memory_space<vmem>>, vector<64x128xbf16>
    tpu.vector_store %arg4[%c0_6, %c0_7], %8 {strides = array<i32>} : memref<64x128xbf16, #tpu.memory_space<vmem>>, vector<64x128xbf16>,
    return
  }
  func.func @transform_0(%arg0: i32) -> (i32, i32) {
    %c0_i32 = arith.constant 0 : i32
    %c0_i32_0 = arith.constant 0 : i32
    return %arg0, %c0_i32 : i32, i32
  }
  func.func @transform_1(%arg0: i32) -> (i32, i32) {
    %c0_i32 = arith.constant 0 : i32
    %c0_i32_0 = arith.constant 0 : i32
    %c0_i32_1 = arith.constant 0 : i32
    return %c0_i32, %c0_i32_0 : i32, i32
  }
  func.func @transform_2(%arg0: i32) -> (i32, i32) {
    %c0_i32 = arith.constant 0 : i32
    %c0_i32_0 = arith.constant 0 : i32
    %c0_i32_1 = arith.constant 0 : i32
    return %c0_i32, %c0_i32_0 : i32, i32
  }
  func.func @transform_3(%arg0: i32) -> (i32, i32) {
    %c0_i32 = arith.constant 0 : i32
    %c0_i32_0 = arith.constant 0 : i32
    return %arg0, %c0_i32 : i32, i32
  }
}

</mosaic_0001>

<bundles_post_ra>
// kernel: tpu_custom_call.1
= control target key start
LH: loop header
LB: loop body
LE: loop exit
PB: predicated region body
PF: predicated region fallthrough
CT: control target
= control target key end

     0   :  { %8 = vsyncpa [#allocation3], 0  ;;  %s1185_s0 = inlined_call_operand.hbm [shape: bf16[128,128], index: 0, kind: input, shape index: {}]   ;;  %s1186_s1 = inlined_call_operand.hbm [shape: bf16[128,128], index: 1, kind: input, shape index: {}]   ;;  %s1187_s2 = inlined_call_operand.hbm [shape: f32[1,128], index: 2, kind: input, shape index: {}]   ;;  %s1188_s3 = inlined_call_operand.hbm [shape: bf16[128,128], index: 3, kind: output, shape index: {}]  }
   0x1   :  { %10 = vsyncpa [#allocation3 + $0x1], 0 }
   0x2   :  { %11 = vsyncpa [#allocation6], 0 }
   0x3   :  { %12 = vsyncpa [#allocation4], 0 }
   0x4   :  { %14 = vsyncpa [#allocation4 + $0x1], 0  ;;  %s934_s12 = smov 0   ;;  %s936_s13 = smov 0  }
   0x5   :  { %s938_s14 = smov 0   ;;  %s940_s15 = smov 0  }
   0x6 LB: > { %s955_s16 = sadd.s32 4294967295, %s904_s15   ;;  %s541_s17 = sadd.s32 4294967294, %s904_s15   ;;  %s904_s15 = sphi %s940_s15, %s1208_s15   ;;  %s900_s14 = sphi %s938_s14, %s1207_s14   ;;  %s896_s13 = sphi %s936_s13, %s1206_s13   ;;  %s892_s12 = sphi %s934_s12, %s1205_s12  }
   0x7   : > { %p40_p0 = scmp.ne.s32.totalorder %s896_s13, %s892_s12  ;;  %p1189_p1 = scmp.eq.s32.totalorder %s955_s16, 0 }
   0x8   : > { %p112_p3 = scmp.eq.s32.totalorder %s541_s17, 1  ;;  %p542_p5 = scmp.ge.s32.totalorder %s904_s15, 1 }
   0x9   : > { %p964_p4 = por %p1189_p1, %p40_p0  ;;  %p119_p7 = scmp.lt.s32.totalorder %s904_s15, 3 }
   0xa   : > { %p969_p6 = por %p112_p3, %p40_p0  ;;  %s906_s21 = smov [#allocation5]  }
   0xb   : > { %s1192_s18 = scalar_select %p964_p4, 1, 0 }
   0xc   : > { %s1193_s19 = scalar_select %p969_p6, 1, 0 }
   0xd   : > { %p974_p8 = pnand %p542_p5, %p119_p7  ;;  %s131_s22 = sshll.u32 %s906_s21, 4  ;;  %s978_s22 = int_to_ptr.vmem [resolvable:$true] %s131_s22 }
   0xe   : > { %s907_s24 = smov [#allocation7]   ;;  %s748_s28 = scalar_lea.hbm %s1186_s1, 1024 }
   0xf   : > { %p677_p9 = pneg %p974_p8  ;;  %s145_s25 = sshll.u32 %s907_s24, 4  ;;  %s989_s25 = int_to_ptr.vmem [resolvable:$true] %s145_s25 }
  0x10   : > { %p749_p12 = scmp.ne.s32.totalorder %s1186_s1, %s748_s28  ;;  %p755_p5 = scmp.lt.u32.totalorder %s748_s28, %s1186_s1 }
  0x11   : > { %p985_p11 = pnand %p677_p9, %p1189_p1 }
  0x13   : > { %p750_p13 = pneg %p985_p11 }
  0x15   : > { %p751_p0 = pnand %p750_p13, %p749_p12 }
  0x17   : > { %p752_p3 = pneg %p751_p0 }
  0x19   : > { %p757_p7 = pnand %p755_p5, %p752_p3 }
  0x1b   : > { %760 = shalt.err (!%p757_p7)
}
  0x1c   : > { %s761_s6 = scalar_lea.vmem %s978_s22, 1024  ;;  %p769_p2 = scmp.lt.s32.totalorder %s978_s22, %s978_s22 }
  0x1d   : > { %p762_p9 = scmp.ne.s32.totalorder %s978_s22, %s761_s6  ;;  %p770_p12 = scmp.lt.s32.totalorder %s761_s6, %s761_s6 }
  0x1f   : > { %p764_p10 = pnand %p762_p9, %p750_p13  ;;  %p771_p0 = por %p770_p12, %p769_p2 }
  0x21   : > { %p765_p1 = pneg %p764_p10 }
  0x23   : > { %p772_p6 = pnand %p771_p0, %p765_p1 }
  0x25   : > { %775 = shalt.err (!%p772_p6)
}
  0x26   : > { %s908_s7 = smov 64   ;;  %s909_s8 = smov 4  }
  0x27   : > { %680 = dma.hbm_to_vmem [thread:$0]  (!%p985_p11), %s1186_s1, 1024, %s978_s22, [#allocation6], %s908_s7, %s908_s7, %s909_s8  }
  0x28   : > { %s776_s21 = scalar_lea.hbm %s1187_s2, 16 }
  0x29   : > { %p777_p1 = scmp.ne.s32.totalorder %s1187_s2, %s776_s21  ;;  %p783_p10 = scmp.lt.u32.totalorder %s776_s21, %s1187_s2 }
  0x2b   : > { %p779_p2 = pnand %p777_p1, %p750_p13 }
  0x2d   : > { %p780_p6 = pneg %p779_p2 }
  0x2f   : > { %p785_p3 = pnand %p783_p10, %p780_p6 }
  0x31   : > { %788 = shalt.err (!%p785_p3)
}
  0x32   : > { %s789_s22 = scalar_lea.vmem %s989_s25, 16  ;;  %s796_s29 = scalar_lea.vmem %s989_s25, 32 }
  0x33   : > { %p790_p5 = scmp.ne.s32.totalorder %s989_s25, %s789_s22  ;;  %p797_p12 = scmp.lt.s32.totalorder %s989_s25, %s989_s25 }
  0x34   : > { %p798_p0 = scmp.lt.s32.totalorder %s796_s29, %s789_s22 }
  0x35   : > { %p792_p7 = pnand %p790_p5, %p750_p13 }
  0x36   : > { %p799_p1 = por %p798_p0, %p797_p12 }
  0x37   : > { %p793_p9 = pneg %p792_p7 }
  0x39   : > { %p800_p2 = pnand %p799_p1, %p793_p9 }
  0x3b   : > { %803 = shalt.err (!%p800_p2)
}
  0x3c   : > { %683 = dma.hbm_to_vmem [thread:$0]  (!%p985_p11), %s1187_s2, 16, %s989_s25, [#allocation6]  }
  0x3d   : > { %s1048_s5 = sadd.s32 1, %s904_s15   ;;  %s27_s23 = sadd.s32 1, %s900_s14 }
  0x3e   : > { %s24_s6 = ssub.s32 %s904_s15, %s1048_s5  ;;  %p34_p13 = scmp.ne.s32.totalorder %s900_s14, %s896_s13 }
  0x3f   : > { %p25_p6 = scmp.eq.s32.totalorder %s24_s6, 0  ;;  %p35_p10 = scmp.eq.s32.totalorder %s904_s15, 0 }
  0x40   : > { %p1196_p3 = scmp.eq.s32.totalorder %s955_s16, 1  ;;  %p694_p7 = scmp.lt.s32.totalorder %s904_s15, 2 }
  0x41   : > { %s1064_s10 = scalar_select %p25_p6, %s900_s14, %s27_s23  }
  0x42   : > { %p1058_p5 = por %p1196_p3, %p34_p13  ;;  %p36_p9 = por %p35_p10, %p34_p13 }
  0x43   : > { %s156_s11 = sand.u32 1, %s900_s14   ;;  %s580_s25 = sshll.u32 %s904_s15, 9 }
  0x44   : > { %s1197_s9 = scalar_select %p1058_p5, 1, 0 }
  0x45   : > { %s546_s17 = sshll.u32 %s156_s11, 5  ;;  %s1071_s26 = scalar_lea.hbm %s1185_s0, %s580_s25 }
  0x46   : > { %s160_s27 = scalar_lea.vmem [#allocation2], %s546_s17  ;;  %p1075_p11 = pnand %p694_p7, %p36_p9 }
  0x47   : > { %s167_s28 = sshll.u32 %s160_s27, 4  ;;  %s1079_s29 = scalar_lea.sflag [#allocation3], %s156_s11  ;;  %s1073_s28 = int_to_ptr.vmem [resolvable:$true] %s167_s28 }
  0x48   : > { %s804_s30 = scalar_lea.hbm %s1071_s26, 512  ;;  %p806_p0 = pneg %p1075_p11 }
  0x49   : > { %p805_p12 = scmp.ne.s32.totalorder %s1071_s26, %s804_s30  ;;  %s809_s6 = scalar_lea.hbm %s1185_s0, 1024 }
  0x4a   : > { %p810_p13 = scmp.lt.u32.totalorder %s1071_s26, %s1185_s0  ;;  %p811_p6 = scmp.lt.u32.totalorder %s809_s6, %s804_s30 }
  0x4b   : > { %p807_p1 = pnand %p806_p0, %p805_p12  ;;  %p813_p3 = scmp.lt.u32.totalorder %s804_s30, %s1071_s26 }
  0x4c   : > { %p812_p10 = por %p811_p6, %p810_p13 }
  0x4d   : > { %p808_p2 = pneg %p807_p1 }
  0x4e   : > { %p814_p7 = por %p813_p3, %p812_p10 }
  0x50   : > { %p815_p9 = pnand %p814_p7, %p808_p2 }
  0x52   : > { %818 = shalt.err (!%p815_p9)
}
  0x53   : > { %s819_s11 = scalar_lea.vmem %s1073_s28, 512  ;;  %s910_s21 = smov [#allocation2]  }
  0x54   : > { %p820_p12 = scmp.ne.s32.totalorder %s1073_s28, %s819_s11  ;;  %s824_s24 = sshll.u32 %s910_s21, 4  ;;  %s825_s24 = int_to_ptr.vmem [resolvable:$false] %s824_s24 }
  0x55   : > { %s826_s27 = scalar_lea.vmem %s825_s24, 1024  ;;  %p827_p4 = scmp.lt.s32.totalorder %s1073_s28, %s825_s24 }
  0x56   : > { %p822_p1 = pnand %p820_p12, %p806_p0  ;;  %p828_p13 = scmp.lt.s32.totalorder %s826_s27, %s819_s11 }
  0x58   : > { %p823_p5 = pneg %p822_p1  ;;  %p829_p6 = por %p828_p13, %p827_p4 }
  0x5a   : > { %p830_p10 = pnand %p829_p6, %p823_p5 }
  0x5c   : > { %833 = shalt.err (!%p830_p10)
}
  0x5d   : > { %687 = dma.hbm_to_vmem [thread:$0]  (!%p1075_p11), %s1071_s26, 512, %s1073_s28, %s1079_s29, %s908_s7, %s908_s7, %s909_s8  }
  0x5e   : > { %179 = sbr.rel (%p974_p8) target bundleno = 374 (0x176), region = 32  ;;  %s1113_s30 = sand.u32 (!%p974_p8), 1, %s896_s13  }
  0x5f   : > { %s550_s4 = sshll.u32 (!%p974_p8), %s1113_s30, 5  ;;  %s182_s23 = scalar_lea.sflag (!%p974_p8), [#allocation3], %s1113_s30 }
  0x60   : > { %s1119_s22 = scalar_lea.vmem (!%p974_p8), [#allocation2], %s550_s4  ;;  %p1199_p4 = scmp.ne.s32.totalorder (!%p974_p8), %s1192_s18, 0 }
  0x65   : > { %879 = dma.done.wait (%p1199_p4), %s182_s23, 512  }
  0x66   : > { %881 = vsyncadd (%p1199_p4), %s182_s23, 4294966784  ;;  %p1200_p5 = scmp.eq.s32.totalorder %s955_s16, 0 }
  0x68   : > { %883 = dma.done.wait (%p1200_p5), [#allocation6], 1040   ;;  %p1201_p8 = pmov %p1200_p5 }
  0x69   : > { %v736_v0 = vld [vmem:[#allocation5] sm:$0xff]   ;;  %v737_v1 = vld [vmem:[#allocation5 + $0x8] sm:$0xff]   ;;  %v738_v2 = vld [vmem:[#allocation5 + $0x10] sm:$0xff]   ;;  %s215_s18 = scalar_lea.vmem [#allocation8], %s550_s4  ;;  %s589_s7 = sshll.u32 %s955_s16, 9 }
  0x6a   : > { %885 = vsyncadd (%p1201_p8), [#allocation6], 4294966256  ;;  %625 = vmatprep.subr.bf16.mxu0 %v736_v0  ;;  %649 = vmatprep.subr.bf16.mxu1 %v736_v0  ;;  %v739_v3 = vld [vmem:[#allocation5 + $0x18] sm:$0xff]   ;;  %v744_v4 = vld [vmem:[%s1119_s22] sm:$0xff]   ;;  %s449_s20 = sshll.u32 %s215_s18, 4  ;;  %s1141_s16 = scalar_lea.hbm %s1188_s3, %s589_s7  ;;  %s1136_s20 = int_to_ptr.vmem [resolvable:$true] %s449_s20 }
  0x6b   : > { %626 = vmatpush3.bf16.msra.mxu0 %v736_v0  ;;  %657 = vmatpush3.bf16.msra.mxu1 %v736_v0  ;;  %v745_v5 = vld [vmem:[%s1119_s22 + $0x10] sm:$0xff]   ;;  %v740_v6 = vld [vmem:[#allocation5 + $0x20] sm:$0xff]   ;;  %v741_v7 = vld [vmem:[#allocation5 + $0x28] sm:$0xff]   ;;  %s436_s28 = scalar_lea.sflag [#allocation4], %s1113_s30  ;;  %s834_s29 = scalar_lea.vmem %s1136_s20, 512 }
  0x6c   : > { %627 = vmatprep.subr.bf16.mxu0 %v737_v1  ;;  %650 = vmatprep.subr.bf16.mxu1 %v737_v1  ;;  %v742_v8 = vld [vmem:[#allocation5 + $0x30] sm:$0xff]   ;;  %v743_v9 = vld [vmem:[#allocation5 + $0x38] sm:$0xff]   ;;  %v746_v10 = vld [vmem:[%s1119_s22 + $0x8] sm:$0xff]   ;;  %p835_p11 = scmp.ne.s32.totalorder %s1136_s20, %s834_s29  ;;  %p1202_p0 = scmp.ne.s32.totalorder %s1197_s9, 0 }
  0x6d   : > { %641 = vmatprep.mubr.bf16.mxu0 %v744_v4  ;;  %645 = vmatprep.mubr.bf16.mxu1 %v745_v5  ;;  %v747_v11 = vld [vmem:[%s1119_s22 + $0x18] sm:$0xff]   ;;  %v554_v12 = vld [vmem:[#allocation7] ss:$0 sm:$0xff]  ;;  %s911_s6 = smov [#allocation8]  }
  0x6e   : > { %p836_p2 = pnand %p835_p11, %p1202_p0  ;;  %s838_s17 = sshll.u32 %s911_s6, 4  ;;  %s839_s17 = int_to_ptr.vmem [resolvable:$false] %s838_s17 }
  0x6f   : > { %628 = vmatpush3.bf16.msra.mxu0 %v737_v1  ;;  %658 = vmatpush3.bf16.msra.mxu1 %v737_v1  ;;  %s840_s25 = scalar_lea.vmem %s839_s17, 1024  ;;  %p841_p7 = scmp.lt.s32.totalorder %s1136_s20, %s839_s17 }
  0x70   : > { %629 = vmatprep.subr.bf16.mxu0 %v738_v2  ;;  %651 = vmatprep.subr.bf16.mxu1 %v738_v2  ;;  %p837_p3 = pneg %p836_p2  ;;  %p842_p9 = scmp.lt.s32.totalorder %s840_s25, %s834_s29 }
  0x72   : > { %p843_p12 = por %p842_p9, %p841_p7 }
  0x73   : > { %630 = vmatpush3.bf16.msra.mxu0 %v738_v2  ;;  %659 = vmatpush3.bf16.msra.mxu1 %v738_v2 }
  0x74   : > { %631 = vmatprep.subr.bf16.mxu0 %v739_v3  ;;  %652 = vmatprep.subr.bf16.mxu1 %v739_v3  ;;  %p844_p1 = pnand %p843_p12, %p837_p3 }
  0x77   : > { %632 = vmatpush3.bf16.msra.mxu0 %v739_v3  ;;  %660 = vmatpush3.bf16.msra.mxu1 %v739_v3 }
  0x78   : > { %633 = vmatprep.subr.bf16.mxu0 %v740_v6  ;;  %653 = vmatprep.subr.bf16.mxu1 %v740_v6 }
  0x7b   : > { %634 = vmatpush3.bf16.msra.mxu0 %v740_v6  ;;  %661 = vmatpush3.bf16.msra.mxu1 %v740_v6 }
  0x7c   : > { %635 = vmatprep.subr.bf16.mxu0 %v741_v7  ;;  %654 = vmatprep.subr.bf16.mxu1 %v741_v7 }
  0x7f   : > { %636 = vmatpush3.bf16.msra.mxu0 %v741_v7  ;;  %662 = vmatpush3.bf16.msra.mxu1 %v741_v7 }
  0x80   : > { %637 = vmatprep.subr.bf16.mxu0 %v742_v8  ;;  %655 = vmatprep.subr.bf16.mxu1 %v742_v8 }
  0x83   : > { %638 = vmatpush3.bf16.msra.mxu0 %v742_v8  ;;  %663 = vmatpush3.bf16.msra.mxu1 %v742_v8 }
  0x84   : > { %639 = vmatprep.subr.bf16.mxu0 %v743_v9  ;;  %656 = vmatprep.subr.bf16.mxu1 %v743_v9 }
  0x87   : > { %640 = vmatpush3.bf16.msra.mxu0 %v743_v9  ;;  %664 = vmatpush3.bf16.msra.mxu1 %v743_v9 }
  0x8a   : > { %642 = vmatmul.mubr.bf16.vlgmr.msra.gmra.mrb[0].mxu0 %v746_v10  ;;  %646 = vmatmul.mubr.bf16.vlgmr.msra.gmra.mrb[0].mxu1 %v747_v11 }
 0x15d   : > { %v643_v13 = vpop.f32.mrb[0].mxu0  ;;  %v647_v14 = vpop.f32.mrb[0].mxu1 }
 0x15e   : > { %v365_v15 = vadd.f32 %v643_v13, %v554_v12  ;;  %v381_v16 = vadd.f32 %v647_v14, %v554_v12  ;;  %v356_v17 = vpop.f32.mrb[1].mxu0  ;;  %v372_v18 = vpop.f32.mrb[1].mxu1 }
 0x15f   : > { %v357_v19 = vadd.f32 %v554_v12, %v356_v17  ;;  %v373_v20 = vadd.f32 %v554_v12, %v372_v18  ;;  %v644_v21 = vpop.f32.mrb[2].mxu0  ;;  %v648_v22 = vpop.f32.mrb[2].mxu1 }
 0x160   : > { %v368_v23 = vadd.f32 %v644_v21, %v554_v12  ;;  %v384_v24 = vadd.f32 %v648_v22, %v554_v12  ;;  %v359_v25 = vpop.f32.mrb[3].mxu0  ;;  %v375_v26 = vpop.f32.mrb[3].mxu1  ;;  %v389_v29 = vmax.f32 %v365_v15, 0.0  ;;  %v393_v30 = vmax.f32 %v381_v16, 0.0 }
 0x161   : > { %v360_v27 = vadd.f32 %v554_v12, %v359_v25  ;;  %v376_v28 = vadd.f32 %v554_v12, %v375_v26  ;;  %v387_v33 = vmax.f32 %v357_v19, 0.0  ;;  %v391_v34 = vmax.f32 %v373_v20, 0.0 }
 0x162   : > { %v390_v31 = vmax.f32 %v368_v23, 0.0  ;;  %v394_v32 = vmax.f32 %v384_v24, 0.0 }
 0x163   : > { %v388_v35 = vmax.f32 %v360_v27, 0.0  ;;  %v392_v36 = vmax.f32 %v376_v28, 0.0 }
 0x164   : > { %v598_v37 = vpack.c.bf16 %v390_v31, %v389_v29  ;;  %v608_v38 = vpack.c.bf16 %v394_v32, %v393_v30 }
 0x165   : > { %v593_v39 = vpack.c.bf16 %v388_v35, %v387_v33  ;;  %v603_v40 = vpack.c.bf16 %v392_v36, %v391_v34 }
 0x166   : > { %610 = vst [vmem:[%s215_s18 + $0x8] sm:$0xff] %v598_v37   ;;  %612 = vst [vmem:[%s215_s18 + $0x18] sm:$0xff] %v608_v38  }
 0x167   : > { %594 = vst [vmem:[%s215_s18] sm:$0xff] %v593_v39   ;;  %611 = vst [vmem:[%s215_s18 + $0x10] sm:$0xff] %v603_v40  }
 0x168   : > { %847 = shalt.err (!%p844_p1)
}
 0x169   : > { %s848_s11 = scalar_lea.hbm %s1141_s16, 512  ;;  %s852_s27 = scalar_lea.hbm %s1188_s3, 1024 }
 0x16a   : > { %p849_p13 = scmp.ne.s32.totalorder %s1141_s16, %s848_s11  ;;  %p853_p4 = scmp.lt.u32.totalorder %s1141_s16, %s1188_s3 }
 0x16b   : > { %p854_p5 = scmp.lt.u32.totalorder %s852_s27, %s848_s11  ;;  %p856_p11 = scmp.lt.u32.totalorder %s848_s11, %s1141_s16 }
 0x16c   : > { %p850_p6 = pnand %p849_p13, %p1202_p0 }
 0x16d   : > { %p855_p8 = por %p854_p5, %p853_p4 }
 0x16e   : > { %p851_p10 = pneg %p850_p6 }
 0x16f   : > { %p857_p2 = por %p856_p11, %p855_p8 }
 0x171   : > { %p858_p3 = pnand %p857_p2, %p851_p10 }
 0x173   : > { %861 = shalt.err (!%p858_p3)
}
 0x174   : > { %s912_s22 = smov 64   ;;  %s913_s18 = smov 4  }
 0x175   : > { %675 = dma.vmem_to_hbm [thread:$0]  (%p1202_p0), %s1136_s20, 512, %s1141_s16, %s436_s28, %s912_s22, %s912_s22, %s913_s18  }
 0x176 PF: > { %s464_s7 = sand.u32 1, %s892_s12   ;;  %p1203_p7 = scmp.ne.s32.totalorder %s1193_s19, 0 }
 0x177   : > { %p1204_p9 = scmp.ge.s32.totalorder %s904_s15, 2  ;;  %s465_s8 = scalar_lea.sflag [#allocation4], %s464_s7 }
 0x179   : > { %p689_p12 = pnand %p1204_p9, %p1203_p7 }
 0x17b   : > { %887 = dma.done.wait (!%p689_p12), %s465_s8, 512  }
 0x17c   : > { %889 = vsyncadd (!%p689_p12), %s465_s8, 4294966784  ;;  %p17_p1 = scmp.ge.s32.totalorder %s1048_s5, 4   ;;  %s1205_s12 = smov %s896_s13 }
 0x17d   : > { %s1206_s13 = smov %s900_s14  ;;  %s1207_s14 = smov %s1064_s10 }
 0x17e   : > { %s1208_s15 = smov %s1048_s5  ;;  %19 = sbr.rel (!%p17_p1) target bundleno = 6 (0x6), region = 85 }
 0x185   :  { %470 = vsyncpa [#allocation3], 1 }
 0x186   :  { %472 = vsyncpa [#allocation3 + $0x1], 1 }
 0x187   :  { %473 = vsyncpa [#allocation6], 1 }
 0x188   :  { %474 = vsyncpa [#allocation4], 1 }
 0x189   :  { %476 = vsyncpa [#allocation4 + $0x1], 1 }

</bundles_post_ra>
